<compile_context>
chip_gen: v5e
topology: v5e:2x2
jax: 0.10.0
libtpu: 0.0.40
codegen_flags: <defaults>
</compile_context>

<pallas_src>
import functools

import jax
import jax.numpy as jnp
import numpy as np
from jax.experimental import pallas as pl
from jax.experimental.pallas import tpu as pltpu


# Column layout of the packed per-channel parameter slab `pc` of shape (C, 15):
#   [0:9]  depthwise 3x3 weights (tap k = 3*(dy+1) + (dx+1), column 4 = center)
#   [9]    depthwise conv bias
#   [10]   pointwise (1x1) conv bias
#   [11]   BN gamma          [12] BN beta
#   [13]   SE fc1 bias (zero-padded from C//r to C rows)
#   [14]   SE fc2 bias
#
# Row layout of the packed weight slab `wpack` of shape (3C, C):
#   [0:C]    pointwise conv weight (C_out, C_in)
#   [C:2C]   SE fc1 weight, zero-padded (C//r, C) -> (C, C)
#   [2C:3C]  SE fc2 weight, zero-padded (C, C//r) -> (C, C)
#
# Row layout of the mask slab `masks` of shape (8+N, NHW):
#   [0:8]    boundary-validity mask (1.0 / 0.0) for the 8 non-center taps
#   [8:8+N]  one-hot row per batch plane (used for SE pooling and SE broadcast)


def _res_se_kernel(x_ref, pc_ref, w_ref, msk_ref, out_ref, *,
                   eps, W, HW, N, C, matmul_dtype):
    x = x_ref[...].astype(jnp.float32)                 # (C, NHW), lane-dense
    NHW = x.shape[1]

    # ---- depthwise 3x3 conv, padding=1, groups=C -----------------------------
    # roll is an XLU op (otherwise idle); boundary masks are precomputed host
    # side, so each tap is roll + 2 VPU muls + 1 VPU add (no iota/div/mod/cmp).
    acc = x * pc_ref[:, 4:5]                            # center tap (dy=dx=0)
    mi = 0
    for k in range(9):
        if k == 4:
            continue
        dy, dx = k // 3 - 1, k % 3 - 1
        off = dy * W + dx
        # shifted[p] == x[p + off] (circular; wrap/cross-plane lanes are zeroed
        # by the precomputed tap mask).  Independent rolls from x expose ILP
        # across the 2 (v6e/v7x) or 3 (v5e) XLU units.
        shifted = pltpu.roll(x, (-off) % NHW, axis=1)
        acc = acc + (shifted * msk_ref[mi:mi + 1, :]) * pc_ref[:, k:k + 1]
        mi += 1
    acc = acc + pc_ref[:, 9:10]                         # depthwise bias

    # ---- BatchNorm2d (training-mode batch stats), single data pass -----------
    inv_nhw = 1.0 / NHW
    s1 = jnp.sum(acc, axis=1, keepdims=True)            # (C, 1)
    s2 = jnp.sum(acc * acc, axis=1, keepdims=True)      # (C, 1)
    mean = s1 * inv_nhw
    var = s2 * inv_nhw - mean * mean                    # E[x^2] - E[x]^2 (f32)
    a = pc_ref[:, 11:12] * jax.lax.rsqrt(var + eps)     # EUP rsqrt
    b = pc_ref[:, 12:13] - mean * a
    h = acc * a + b                                     # single VPU FMA pass

    # ---- Hardswish: x * relu6(x + 3) / 6 --------------------------------------
    h = h * jnp.clip(h + 3.0, 0.0, 6.0) * (1.0 / 6.0)

    # ---- 1x1 conv (pointwise): one MXU matmul ---------------------------------
    # matmul_dtype=bf16 gives 2x MXU throughput on v5e/v6e/v7x (all have native
    # bf16 MXUs); f32 accumulation is kept and all elementwise math stays f32,
    # so it is also safe on v5e (whose VPU/EUP lack bf16).
    pw_w = w_ref[0:C, :]
    y = jnp.dot(pw_w.astype(matmul_dtype), h.astype(matmul_dtype),
                preferred_element_type=jnp.float32) + pc_ref[:, 10:11]

    # ---- Squeeze-Excitation ----------------------------------------------------
    # Global average pool: contract the lane axis of y against the (N, NHW)
    # plane one-hots (no padded (NHW, N) operand, no extra DMA).
    plane = msk_ref[8:8 + N, :]                          # (N, NHW)
    pool = jax.lax.dot_general(
        y, plane, (((1,), (1,)), ((), ())),
        preferred_element_type=jnp.float32) * (1.0 / HW)  # (C, N)
    # SE MLP kept in f32 (tiny; zero-padded weights/biases make padded rows
    # exactly zero so no ragged slicing is needed).
    fc1_w = w_ref[C:2 * C, :]
    fc2_w = w_ref[2 * C:3 * C, :]
    z1 = jnp.maximum(jnp.dot(fc1_w, pool, preferred_element_type=jnp.float32)
                     + pc_ref[:, 13:14], 0.0)            # ReLU
    z2 = jnp.dot(fc2_w, z1, preferred_element_type=jnp.float32) + pc_ref[:, 14:15]
    s = jax.nn.sigmoid(z2)                               # (C, N)

    # ---- SE channel-scale broadcast (pure VPU) + fused residual add -----------
    # s_full[c, p] = s[c, plane(p)];  built from s[:,0] plus per-plane deltas so
    # the K=2 tail matmul (un-hidable MXU latency) is gone.
    s_full = s[:, 0:1]
    for n in range(1, N):
        s_full = s_full + (s[:, n:n + 1] - s[:, 0:1]) * msk_ref[8 + n:9 + n, :]
    out_ref[...] = (y * s_full + x).astype(out_ref.dtype)


@functools.lru_cache(maxsize=None)
def _tap_and_plane_masks(N, H, W):
    """Host-side constant: 8 tap boundary masks + N plane one-hots, (8+N, NHW)."""
    HW = H * W
    NHW = N * HW
    p = np.arange(NHW)
    h_idx = (p % HW) // W
    w_idx = p % W
    rows = []
    for k in range(9):
        if k == 4:
            continue
        dy, dx = k // 3 - 1, k % 3 - 1
        m = np.ones(NHW, np.bool_)
        if dy == -1:
            m &= h_idx >= 1
        elif dy == 1:
            m &= h_idx <= H - 2
        if dx == -1:
            m &= w_idx >= 1
        elif dx == 1:
            m &= w_idx <= W - 2
        rows.append(m)
    plane_id = p // HW
    for n in range(N):
        rows.append(plane_id == n)
    return np.stack(rows).astype(np.float32)


def pack_params(params):
    """Pack the 11 small parameter arrays into two slabs (do ONCE per network)."""
    C = params["pw_w"].shape[0]
    cr = params["fc1_w"].shape[0]
    fc1_b_pad = jnp.zeros((C, 1), jnp.float32).at[:cr].set(params["fc1_b"])
    pc = jnp.concatenate(
        [params["dw_w"], params["dw_b"], params["pw_b"],
         params["bn_g"], params["bn_b"], fc1_b_pad, params["fc2_b"]],
        axis=1)                                                      # (C, 15)
    fc1_w_pad = jnp.zeros((C, C), jnp.float32).at[:cr, :].set(params["fc1_w"])
    fc2_w_pad = jnp.zeros((C, C), jnp.float32).at[:, :cr].set(params["fc2_w"])
    wpack = jnp.concatenate([params["pw_w"], fc1_w_pad, fc2_w_pad], axis=0)  # (3C, C)
    return pc, wpack


def res_se_block_lane_dense(x2, pc, wpack, masks, *, H, W, eps=1e-5,
                            matmul_dtype=jnp.float32):
    """Fused ResSEBlock on the lane-dense layout.  x2: (C, N*H*W) float32."""
    C, NHW = x2.shape
    HW = H * W
    N = NHW // HW
    vmem = pl.BlockSpec(memory_space=pltpu.MemorySpace.VMEM)
    kernel = functools.partial(_res_se_kernel, eps=eps, W=W, HW=HW, N=N, C=C,
                               matmul_dtype=matmul_dtype)
    # TODO(synk): for non-toy N*H*W, add a grid over the lane axis (tiles in
    # multiples of (8,128)): mark a batch/spatial axis "parallel" so v7x's two
    # TensorCores both get work, keep the BN reduction axis "arbitrary" and
    # last with a two-pass cross-tile mean/var, give each tile halo rows/cols
    # (the circular rolls no longer see neighbors across a tile), and budget
    # (inputs + output + scratch) x double-buffering against v7x's 64 MiB
    # physical / 32 MiB default scoped VMEM (raise vmem_limit_bytes if needed).
    # At this size the whole problem is a few vregs; one un-gridded call wins.
    return pl.pallas_call(
        kernel,
        out_shape=jax.ShapeDtypeStruct((C, NHW), x2.dtype),
        in_specs=[vmem, vmem, vmem, vmem],
        out_specs=vmem,
    )(x2, pc, wpack, masks)


def res_se_block(x, params, *, eps=1e-5, matmul_dtype=jnp.float32):
    """NCHW convenience wrapper.  x: (N, C, H, W) float32.

    In a chained network, keep activations in the lane-dense (C, N*H*W) layout
    and call `res_se_block_lane_dense` directly so the relayout transposes and
    the parameter/mask packing are paid once per network, not once per block.
    """
    N, C, H, W = x.shape
    pc, wpack = pack_params(params)
    masks = jnp.asarray(_tap_and_plane_masks(N, H, W))
    x2 = jnp.transpose(x, (1, 0, 2, 3)).reshape(C, N * H * W)
    out2 = res_se_block_lane_dense(x2, pc, wpack, masks, H=H, W=W, eps=eps,
                                   matmul_dtype=matmul_dtype)
    return jnp.transpose(out2.reshape(C, N, H, W), (1, 0, 2, 3))


def make_params(key, channels, reduction=4):
    c, cr = channels, channels // reduction
    ks = jax.random.split(key, 8)
    u = lambda k, shape, bound: jax.random.uniform(
        k, shape, jnp.float32, -bound, bound)
    # conv1: depthwise 3x3 (PyTorch weight (C,1,3,3) stored as (C,9)), fan_in=9
    dw_w = u(ks[0], (c, 9), 1.0 / np.sqrt(9.0))
    dw_b = u(ks[1], (c, 1), 1.0 / np.sqrt(9.0))
    # conv2: 1x1 (weight (C,C,1,1) stored as (C_out, C_in)), fan_in = C
    pw_w = u(ks[2], (c, c), 1.0 / np.sqrt(c))
    pw_b = u(ks[3], (c, 1), 1.0 / np.sqrt(c))
    # BatchNorm affine params
    bn_g = jnp.ones((c, 1), jnp.float32)
    bn_b = jnp.zeros((c, 1), jnp.float32)
    # SE fc1: Linear(C -> C//r), fc2: Linear(C//r -> C)
    fc1_w = u(ks[4], (cr, c), 1.0 / np.sqrt(c))
    fc1_b = u(ks[5], (cr, 1), 1.0 / np.sqrt(c))
    fc2_w = u(ks[6], (c, cr), 1.0 / np.sqrt(cr))
    fc2_b = u(ks[7], (c, 1), 1.0 / np.sqrt(cr))
    return {
        "dw_w": dw_w, "dw_b": dw_b,
        "pw_w": pw_w, "pw_b": pw_b,
        "bn_g": bn_g, "bn_b": bn_b,
        "fc1_w": fc1_w, "fc1_b": fc1_b,
        "fc2_w": fc2_w, "fc2_b": fc2_b,
    }


def res_se_block_ref(x, params, *, eps=1e-5):
    """Pure-JAX NCHW reference (same math, no Pallas) for correctness check."""
    N, C, H, W = x.shape
    xp = jnp.pad(x, ((0, 0), (0, 0), (1, 1), (1, 1)))
    acc = jnp.zeros_like(x) + params["dw_b"][:, 0][None, :, None, None]
    for k in range(9):
        ky, kx = k // 3, k % 3
        acc = acc + xp[:, :, ky:ky + H, kx:kx + W] * \
            params["dw_w"][:, k][None, :, None, None]
    mean = jnp.mean(acc, axis=(0, 2, 3), keepdims=True)
    var = jnp.mean(jnp.square(acc - mean), axis=(0, 2, 3), keepdims=True)
    h = (acc - mean) / jnp.sqrt(var + eps) * \
        params["bn_g"][:, 0][None, :, None, None] + \
        params["bn_b"][:, 0][None, :, None, None]
    h = h * jnp.clip(h + 3.0, 0.0, 6.0) / 6.0
    y = jnp.einsum("oi,nihw->nohw", params["pw_w"], h) + \
        params["pw_b"][:, 0][None, :, None, None]
    pool = jnp.mean(y, axis=(2, 3))                                  # (N, C)
    z1 = jax.nn.relu(pool @ params["fc1_w"].T + params["fc1_b"][:, 0][None, :])
    s = jax.nn.sigmoid(z1 @ params["fc2_w"].T + params["fc2_b"][:, 0][None, :])
    return y * s[:, :, None, None] + x


if __name__ == "__main__":
    key = jax.random.PRNGKey(0)
    k_x, k_p = jax.random.split(key)

    N, C, H, W = 2, 8, 16, 16          # in_channels=8, reduction=4
    x = jax.random.normal(k_x, (N, C, H, W), jnp.float32)
    params = make_params(k_p, C, reduction=4)

    ref = jax.block_until_ready(res_se_block_ref(x, params))

    # f32 MXU operands: bit-for-bit comparable to the f32 reference.
    out = jax.block_until_ready(res_se_block(x, params))
    np.testing.assert_allclose(np.asarray(out), np.asarray(ref),
                               rtol=1e-4, atol=1e-4)

    # bf16 MXU operands for the 1x1 conv (2x MXU throughput on v5e/v6e/v7x;
    # elementwise math stays f32).  Tolerance relaxed to bf16 level.
    out_bf16 = jax.block_until_ready(
        res_se_block(x, params, matmul_dtype=jnp.bfloat16))
    np.testing.assert_allclose(np.asarray(out_bf16), np.asarray(ref),
                               rtol=3e-2, atol=3e-2)

    print("KERNEL_OK")
</pallas_src>

<mosaic_0001>
module attributes {stable_mosaic.version = 11 : i64} {
  func.func @_res_se_kernel(%arg0: memref<8x512xf32, #tpu.memory_space<vmem>>, %arg1: memref<8x15xf32, #tpu.memory_space<vmem>>, %arg2: memref<24x8xf32, #tpu.memory_space<vmem>>, %arg3: memref<10x512xf32, #tpu.memory_space<vmem>>, %arg4: memref<8x512xf32, #tpu.memory_space<vmem>>) attributes {dimension_semantics = [], scalar_prefetch = 0 : i64, scratch_operands = 0 : i64, tpu.core_type = #tpu.core_type<tc>} {
    %c0 = arith.constant 0 : index
    %c0_0 = arith.constant 0 : index
    %0 = vector.load %arg0[%c0, %c0_0] : memref<8x512xf32, #tpu.memory_space<vmem>>, vector<8x512xf32>
    %c0_1 = arith.constant 0 : index
    %c4 = arith.constant 4 : index
    %1 = vector.load %arg1[%c0_1, %c4] : memref<8x15xf32, #tpu.memory_space<vmem>>, vector<8x1xf32>
    %2 = vector.broadcast %1 : vector<8x1xf32> to vector<8x512xf32>
    %3 = arith.mulf %0, %2 : vector<8x512xf32>
    %c17_i32 = arith.constant 17 : i32
    %4 = tpu.dynamic_rotate %0 by %c17_i32 dim 1 : vector<8x512xf32>, i32 -> vector<8x512xf32>
    %c0_2 = arith.constant 0 : index
    %c0_3 = arith.constant 0 : index
    %5 = vector.load %arg3[%c0_2, %c0_3] : memref<10x512xf32, #tpu.memory_space<vmem>>, vector<1x512xf32>
    %6 = vector.broadcast %5 : vector<1x512xf32> to vector<8x512xf32>
    %7 = arith.mulf %4, %6 : vector<8x512xf32>
    %c0_4 = arith.constant 0 : index
    %c0_5 = arith.constant 0 : index
    %8 = vector.load %arg1[%c0_4, %c0_5] : memref<8x15xf32, #tpu.memory_space<vmem>>, vector<8x1xf32>
    %9 = vector.broadcast %8 : vector<8x1xf32> to vector<8x512xf32>
    %10 = arith.mulf %7, %9 : vector<8x512xf32>
    %11 = arith.addf %3, %10 : vector<8x512xf32>
    %c16_i32 = arith.constant 16 : i32
    %12 = tpu.dynamic_rotate %0 by %c16_i32 dim 1 : vector<8x512xf32>, i32 -> vector<8x512xf32>
    %c1 = arith.constant 1 : index
    %c0_6 = arith.constant 0 : index
    %13 = vector.load %arg3[%c1, %c0_6] : memref<10x512xf32, #tpu.memory_space<vmem>>, vector<1x512xf32>
    %14 = vector.broadcast %13 : vector<1x512xf32> to vector<8x512xf32>
    %15 = arith.mulf %12, %14 : vector<8x512xf32>
    %c0_7 = arith.constant 0 : index
    %c1_8 = arith.constant 1 : index
    %16 = vector.load %arg1[%c0_7, %c1_8] : memref<8x15xf32, #tpu.memory_space<vmem>>, vector<8x1xf32>
    %17 = vector.broadcast %16 : vector<8x1xf32> to vector<8x512xf32>
    %18 = arith.mulf %15, %17 : vector<8x512xf32>
    %19 = arith.addf %11, %18 : vector<8x512xf32>
    %c15_i32 = arith.constant 15 : i32
    %20 = tpu.dynamic_rotate %0 by %c15_i32 dim 1 : vector<8x512xf32>, i32 -> vector<8x512xf32>
    %c2 = arith.constant 2 : index
    %c0_9 = arith.constant 0 : index
    %21 = vector.load %arg3[%c2, %c0_9] : memref<10x512xf32, #tpu.memory_space<vmem>>, vector<1x512xf32>
    %22 = vector.broadcast %21 : vector<1x512xf32> to vector<8x512xf32>
    %23 = arith.mulf %20, %22 : vector<8x512xf32>
    %c0_10 = arith.constant 0 : index
    %c2_11 = arith.constant 2 : index
    %24 = vector.load %arg1[%c0_10, %c2_11] : memref<8x15xf32, #tpu.memory_space<vmem>>, vector<8x1xf32>
    %25 = vector.broadcast %24 : vector<8x1xf32> to vector<8x512xf32>
    %26 = arith.mulf %23, %25 : vector<8x512xf32>
    %27 = arith.addf %19, %26 : vector<8x512xf32>
    %c1_i32 = arith.constant 1 : i32
    %28 = tpu.dynamic_rotate %0 by %c1_i32 dim 1 : vector<8x512xf32>, i32 -> vector<8x512xf32>
    %c3 = arith.constant 3 : index
    %c0_12 = arith.constant 0 : index
    %29 = vector.load %arg3[%c3, %c0_12] : memref<10x512xf32, #tpu.memory_space<vmem>>, vector<1x512xf32>
    %30 = vector.broadcast %29 : vector<1x512xf32> to vector<8x512xf32>
    %31 = arith.mulf %28, %30 : vector<8x512xf32>
    %c0_13 = arith.constant 0 : index
    %c3_14 = arith.constant 3 : index
    %32 = vector.load %arg1[%c0_13, %c3_14] : memref<8x15xf32, #tpu.memory_space<vmem>>, vector<8x1xf32>
    %33 = vector.broadcast %32 : vector<8x1xf32> to vector<8x512xf32>
    %34 = arith.mulf %31, %33 : vector<8x512xf32>
    %35 = arith.addf %27, %34 : vector<8x512xf32>
    %c511_i32 = arith.constant 511 : i32
    %36 = tpu.dynamic_rotate %0 by %c511_i32 dim 1 : vector<8x512xf32>, i32 -> vector<8x512xf32>
    %c4_15 = arith.constant 4 : index
    %c0_16 = arith.constant 0 : index
    %37 = vector.load %arg3[%c4_15, %c0_16] : memref<10x512xf32, #tpu.memory_space<vmem>>, vector<1x512xf32>
    %38 = vector.broadcast %37 : vector<1x512xf32> to vector<8x512xf32>
    %39 = arith.mulf %36, %38 : vector<8x512xf32>
    %c0_17 = arith.constant 0 : index
    %c5 = arith.constant 5 : index
    %40 = vector.load %arg1[%c0_17, %c5] : memref<8x15xf32, #tpu.memory_space<vmem>>, vector<8x1xf32>
    %41 = vector.broadcast %40 : vector<8x1xf32> to vector<8x512xf32>
    %42 = arith.mulf %39, %41 : vector<8x512xf32>
    %43 = arith.addf %35, %42 : vector<8x512xf32>
    %c497_i32 = arith.constant 497 : i32
    %44 = tpu.dynamic_rotate %0 by %c497_i32 dim 1 : vector<8x512xf32>, i32 -> vector<8x512xf32>
    %c5_18 = arith.constant 5 : index
    %c0_19 = arith.constant 0 : index
    %45 = vector.load %arg3[%c5_18, %c0_19] : memref<10x512xf32, #tpu.memory_space<vmem>>, vector<1x512xf32>
    %46 = vector.broadcast %45 : vector<1x512xf32> to vector<8x512xf32>
    %47 = arith.mulf %44, %46 : vector<8x512xf32>
    %c0_20 = arith.constant 0 : index
    %c6 = arith.constant 6 : index
    %48 = vector.load %arg1[%c0_20, %c6] : memref<8x15xf32, #tpu.memory_space<vmem>>, vector<8x1xf32>
    %49 = vector.broadcast %48 : vector<8x1xf32> to vector<8x512xf32>
    %50 = arith.mulf %47, %49 : vector<8x512xf32>
    %51 = arith.addf %43, %50 : vector<8x512xf32>
    %c496_i32 = arith.constant 496 : i32
    %52 = tpu.dynamic_rotate %0 by %c496_i32 dim 1 : vector<8x512xf32>, i32 -> vector<8x512xf32>
    %c6_21 = arith.constant 6 : index
    %c0_22 = arith.constant 0 : index
    %53 = vector.load %arg3[%c6_21, %c0_22] : memref<10x512xf32, #tpu.memory_space<vmem>>, vector<1x512xf32>
    %54 = vector.broadcast %53 : vector<1x512xf32> to vector<8x512xf32>
    %55 = arith.mulf %52, %54 : vector<8x512xf32>
    %c0_23 = arith.constant 0 : index
    %c7 = arith.constant 7 : index
    %56 = vector.load %arg1[%c0_23, %c7] : memref<8x15xf32, #tpu.memory_space<vmem>>, vector<8x1xf32>
    %57 = vector.broadcast %56 : vector<8x1xf32> to vector<8x512xf32>
    %58 = arith.mulf %55, %57 : vector<8x512xf32>
    %59 = arith.addf %51, %58 : vector<8x512xf32>
    %c495_i32 = arith.constant 495 : i32
    %60 = tpu.dynamic_rotate %0 by %c495_i32 dim 1 : vector<8x512xf32>, i32 -> vector<8x512xf32>
    %c7_24 = arith.constant 7 : index
    %c0_25 = arith.constant 0 : index
    %61 = vector.load %arg3[%c7_24, %c0_25] : memref<10x512xf32, #tpu.memory_space<vmem>>, vector<1x512xf32>
    %62 = vector.broadcast %61 : vector<1x512xf32> to vector<8x512xf32>
    %63 = arith.mulf %60, %62 : vector<8x512xf32>
    %c0_26 = arith.constant 0 : index
    %c8 = arith.constant 8 : index
    %64 = vector.load %arg1[%c0_26, %c8] : memref<8x15xf32, #tpu.memory_space<vmem>>, vector<8x1xf32>
    %65 = vector.broadcast %64 : vector<8x1xf32> to vector<8x512xf32>
    %66 = arith.mulf %63, %65 : vector<8x512xf32>
    %67 = arith.addf %59, %66 : vector<8x512xf32>
    %c0_27 = arith.constant 0 : index
    %c9 = arith.constant 9 : index
    %68 = vector.load %arg1[%c0_27, %c9] : memref<8x15xf32, #tpu.memory_space<vmem>>, vector<8x1xf32>
    %69 = vector.broadcast %68 : vector<8x1xf32> to vector<8x512xf32>
    %70 = arith.addf %67, %69 : vector<8x512xf32>
    %cst = arith.constant dense<0.000000e+00> : vector<8xf32>
    %71 = vector.multi_reduction <add>, %70, %cst [1] : vector<8x512xf32> to vector<8xf32>
    %72 = vector.shape_cast %71 : vector<8xf32> to vector<8x1xf32>
    %73 = arith.mulf %70, %70 : vector<8x512xf32>
    %cst_28 = arith.constant dense<0.000000e+00> : vector<8xf32>
    %74 = vector.multi_reduction <add>, %73, %cst_28 [1] : vector<8x512xf32> to vector<8xf32>
    %75 = vector.shape_cast %74 : vector<8xf32> to vector<8x1xf32>
    %cst_29 = arith.constant 0.001953125 : f32
    %76 = vector.broadcast %cst_29 : f32 to vector<8x1xf32>
    %77 = arith.mulf %72, %76 : vector<8x1xf32>
    %cst_30 = arith.constant 0.001953125 : f32
    %78 = vector.broadcast %cst_30 : f32 to vector<8x1xf32>
    %79 = arith.mulf %75, %78 : vector<8x1xf32>
    %80 = arith.mulf %77, %77 : vector<8x1xf32>
    %81 = arith.subf %79, %80 : vector<8x1xf32>
    %c0_31 = arith.constant 0 : index
    %c11 = arith.constant 11 : index
    %82 = vector.load %arg1[%c0_31, %c11] : memref<8x15xf32, #tpu.memory_space<vmem>>, vector<8x1xf32>
    %cst_32 = arith.constant 9.99999974E-6 : f32
    %83 = vector.broadcast %cst_32 : f32 to vector<8x1xf32>
    %84 = arith.addf %81, %83 : vector<8x1xf32>
    %85 = math.rsqrt %84 : vector<8x1xf32>
    %86 = arith.mulf %82, %85 : vector<8x1xf32>
    %c0_33 = arith.constant 0 : index
    %c12 = arith.constant 12 : index
    %87 = vector.load %arg1[%c0_33, %c12] : memref<8x15xf32, #tpu.memory_space<vmem>>, vector<8x1xf32>
    %88 = arith.mulf %77, %86 : vector<8x1xf32>
    %89 = arith.subf %87, %88 : vector<8x1xf32>
    %90 = vector.broadcast %86 : vector<8x1xf32> to vector<8x512xf32>
    %91 = arith.mulf %70, %90 : vector<8x512xf32>
    %92 = vector.broadcast %89 : vector<8x1xf32> to vector<8x512xf32>
    %93 = arith.addf %91, %92 : vector<8x512xf32>
    %cst_34 = arith.constant 3.000000e+00 : f32
    %94 = vector.broadcast %cst_34 : f32 to vector<8x512xf32>
    %95 = arith.addf %93, %94 : vector<8x512xf32>
    %cst_35 = arith.constant 0.000000e+00 : f32
    %cst_36 = arith.constant 6.000000e+00 : f32
    %96 = vector.broadcast %cst_35 : f32 to vector<8x512xf32>
    %97 = arith.maximumf %96, %95 : vector<8x512xf32>
    %98 = vector.broadcast %cst_36 : f32 to vector<8x512xf32>
    %99 = arith.minimumf %98, %97 : vector<8x512xf32>
    %100 = arith.mulf %93, %99 : vector<8x512xf32>
    %cst_37 = arith.constant 0.166666672 : f32
    %101 = vector.broadcast %cst_37 : f32 to vector<8x512xf32>
    %102 = arith.mulf %100, %101 : vector<8x512xf32>
    %c0_38 = arith.constant 0 : index
    %c0_39 = arith.constant 0 : index
    %103 = vector.load %arg2[%c0_38, %c0_39] : memref<24x8xf32, #tpu.memory_space<vmem>>, vector<8x8xf32>
    %cst_40 = arith.constant dense<0.000000e+00> : vector<8x512xf32>
    %104 = tpu.matmul %103, %102, %cst_40 {dimension_numbers = #tpu.dot_dimension_numbers<[1], [0], [0], [1], [0, 0, 1, 1], [], []>} : vector<8x8xf32>, vector<8x512xf32>, vector<8x512xf32> -> vector<8x512xf32>
    %c0_41 = arith.constant 0 : index
    %c10 = arith.constant 10 : index
    %105 = vector.load %arg1[%c0_41, %c10] : memref<8x15xf32, #tpu.memory_space<vmem>>, vector<8x1xf32>
    %106 = vector.broadcast %105 : vector<8x1xf32> to vector<8x512xf32>
    %107 = arith.addf %104, %106 : vector<8x512xf32>
    %c8_42 = arith.constant 8 : index
    %c0_43 = arith.constant 0 : index
    %108 = vector.load %arg3[%c8_42, %c0_43] : memref<10x512xf32, #tpu.memory_space<vmem>>, vector<2x512xf32>
    %cst_44 = arith.constant dense<0.000000e+00> : vector<8x2xf32>
    %109 = tpu.matmul %107, %108, %cst_44 {dimension_numbers = #tpu.dot_dimension_numbers<[1], [1], [0], [0], [0, 0, 1, 0], [], []>} : vector<8x512xf32>, vector<2x512xf32>, vector<8x2xf32> -> vector<8x2xf32>
    %cst_45 = arith.constant 3.906250e-03 : f32
    %110 = vector.broadcast %cst_45 : f32 to vector<8x2xf32>
    %111 = arith.mulf %109, %110 : vector<8x2xf32>
    %c8_46 = arith.constant 8 : index
    %c0_47 = arith.constant 0 : index
    %112 = vector.load %arg2[%c8_46, %c0_47] : memref<24x8xf32, #tpu.memory_space<vmem>>, vector<8x8xf32>
    %c16 = arith.constant 16 : index
    %c0_48 = arith.constant 0 : index
    %113 = vector.load %arg2[%c16, %c0_48] : memref<24x8xf32, #tpu.memory_space<vmem>>, vector<8x8xf32>
    %cst_49 = arith.constant dense<0.000000e+00> : vector<8x2xf32>
    %114 = tpu.matmul %112, %111, %cst_49 {dimension_numbers = #tpu.dot_dimension_numbers<[1], [0], [0], [1], [0, 0, 1, 1], [], []>} : vector<8x8xf32>, vector<8x2xf32>, vector<8x2xf32> -> vector<8x2xf32>
    %c0_50 = arith.constant 0 : index
    %c13 = arith.constant 13 : index
    %115 = vector.load %arg1[%c0_50, %c13] : memref<8x15xf32, #tpu.memory_space<vmem>>, vector<8x1xf32>
    %116 = vector.broadcast %115 : vector<8x1xf32> to vector<8x2xf32>
    %117 = arith.addf %114, %116 : vector<8x2xf32>
    %cst_51 = arith.constant 0.000000e+00 : f32
    %118 = vector.broadcast %cst_51 : f32 to vector<8x2xf32>
    %119 = arith.maximumf %117, %118 : vector<8x2xf32>
    %cst_52 = arith.constant dense<0.000000e+00> : vector<8x2xf32>
    %120 = tpu.matmul %113, %119, %cst_52 {dimension_numbers = #tpu.dot_dimension_numbers<[1], [0], [0], [1], [0, 0, 1, 1], [], []>} : vector<8x8xf32>, vector<8x2xf32>, vector<8x2xf32> -> vector<8x2xf32>
    %c0_53 = arith.constant 0 : index
    %c14 = arith.constant 14 : index
    %121 = vector.load %arg1[%c0_53, %c14] : memref<8x15xf32, #tpu.memory_space<vmem>>, vector<8x1xf32>
    %122 = vector.broadcast %121 : vector<8x1xf32> to vector<8x2xf32>
    %123 = arith.addf %120, %122 : vector<8x2xf32>
    %124 = arith.negf %123 : vector<8x2xf32>
    %125 = math.exp %124 : vector<8x2xf32>
    %cst_54 = arith.constant 1.000000e+00 : f32
    %126 = vector.broadcast %cst_54 : f32 to vector<8x2xf32>
    %127 = arith.addf %126, %125 : vector<8x2xf32>
    %128 = arith.divf %126, %127 : vector<8x2xf32>
    %129 = vector.extract_strided_slice %128 {offsets = [0, 0], sizes = [8, 1], strides = [1, 1]} : vector<8x2xf32> to vector<8x1xf32>
    %130 = vector.extract_strided_slice %128 {offsets = [0, 1], sizes = [8, 1], strides = [1, 1]} : vector<8x2xf32> to vector<8x1xf32>
    %131 = vector.extract_strided_slice %128 {offsets = [0, 0], sizes = [8, 1], strides = [1, 1]} : vector<8x2xf32> to vector<8x1xf32>
    %132 = arith.subf %130, %131 : vector<8x1xf32>
    %c9_55 = arith.constant 9 : index
    %c0_56 = arith.constant 0 : index
    %133 = vector.load %arg3[%c9_55, %c0_56] : memref<10x512xf32, #tpu.memory_space<vmem>>, vector<1x512xf32>
    %134 = vector.broadcast %132 : vector<8x1xf32> to vector<8x512xf32>
    %135 = vector.broadcast %133 : vector<1x512xf32> to vector<8x512xf32>
    %136 = arith.mulf %134, %135 : vector<8x512xf32>
    %137 = vector.broadcast %129 : vector<8x1xf32> to vector<8x512xf32>
    %138 = arith.addf %137, %136 : vector<8x512xf32>
    %139 = arith.mulf %107, %138 : vector<8x512xf32>
    %140 = arith.addf %139, %0 : vector<8x512xf32>
    %c0_57 = arith.constant 0 : index
    %c0_58 = arith.constant 0 : index
    %141 = vector.load %arg4[%c0_57, %c0_58] : memref<8x512xf32, #tpu.memory_space<vmem>>, vector<8x512xf32>
    tpu.vector_store %arg4[%c0_57, %c0_58], %140 {strides = array<i32>} : memref<8x512xf32, #tpu.memory_space<vmem>>, vector<8x512xf32>,
    return
  }
}

</mosaic_0001>

<bundles_post_ra>
// kernel: tpu_custom_call.1
= control target key start
LH: loop header
LB: loop body
LE: loop exit
PB: predicated region body
PF: predicated region fallthrough
CT: control target
= control target key end

     0   :  { %9 = vsyncpa [#allocation3], 0  ;;  %s1193_s0 = inlined_call_operand.vmem [shape: f32[8,512], index: 0, kind: input, shape index: {}]   ;;  %s1194_s1 = inlined_call_operand.hbm [shape: f32[8,15], index: 1, kind: input, shape index: {}]   ;;  %s1195_s2 = inlined_call_operand.vmem [shape: f32[24,8], index: 2, kind: input, shape index: {}]   ;;  %s1196_s3 = inlined_call_operand.hbm [shape: f32[10,512], index: 3, kind: input, shape index: {}]   ;;  %s1197_s4 = inlined_call_operand.hbm [shape: f32[8,512], index: 4, kind: output, shape index: {}]  }
   0x1   :  { %10 = vsyncpa [#allocation6], 0 }
   0x2   :  { %11 = vsyncpa [#allocation4], 0  ;;  %s19_s17 = sshll.u32 %s1194_s1, 4  ;;  %s915_s18 = smov [#allocation2]   ;;  %s20_s17 = int_to_ptr.hbm [resolvable:$true] %s19_s17 }
   0x3   :  { %s21_s19 = sshll.u32 %s915_s18, 4  ;;  %s31_s22 = sshll.u32 %s1196_s3, 4  ;;  %s22_s19 = int_to_ptr.vmem [resolvable:$true] %s21_s19  ;;  %s32_s22 = int_to_ptr.hbm [resolvable:$true] %s31_s22 }
   0x4   :  { %24 = dma.hbm_to_vmem [thread:$0]  %s20_s17, 128, %s22_s19, [#allocation3]  }
   0x5   :  { %s916_s23 = smov [#allocation5]   ;;  %s917_s25 = smov 512  }
   0x6   :  { %s33_s24 = sshll.u32 %s916_s23, 4  ;;  %s918_s26 = smov 32   ;;  %s34_s24 = int_to_ptr.vmem [resolvable:$true] %s33_s24 }
   0x7   :  { %39 = dma.hbm_to_vmem [thread:$0]  %s32_s22, 1024, %s34_s24, [#allocation6], %s917_s25, %s917_s25, %s918_s26  }
   0x8   :  { %909 = dma.done.wait [#allocation3], 128  }
   0x9   :  { %910 = vsyncadd [#allocation3], 4294967168 }
   0xa   :  { %911 = dma.done.wait [#allocation6], 1024  }
   0xb   :  { %912 = vsyncadd [#allocation6], 4294966272  ;;  %v919_v0 = vmov 4   ;;  %v920_v1 = vmov 0   ;;  %v978_v2 = vld [vmem:[%s1193_s0 + $0x18] sm:$0xff]  ;;  %v983_v3 = vld [vmem:[%s1193_s0] sm:$0xff]  ;;  %v70_v15 = vlaneseq }
   0xc   :  { %813 = vset.pattern.permute.xlu1 %v919_v0  ;;  %814 = vset.pattern.permute.xlu2 %v920_v1  ;;  %s921_s29 = smov 17   ;;  %s922_s30 = smov 16   ;;  %v991_v4 = vld [vmem:[%s1193_s0 + $0x10] sm:$0xff]  ;;  %v996_v5 = vld [vmem:[%s1193_s0 + $0x8] sm:$0xff]  ;;  %v923_v6 = vmov 2   ;;  %v1001_v7 = vld [vmem:[#allocation2] sm:$0xff] }
   0xd   :  { %68 = vrot.lane.b32.xlu1 %v978_v2, %s921_s29  ;;  %62 = vrot.lane.b32.xlu0 %v983_v3, %s921_s29  ;;  %s924_s9 = smov 15   ;;  %v925_v8 = vmov 1   ;;  %s926_s0 = smov 1   ;;  %v928_v9 = vmov 3   ;;  %v929_v10 = vmov 5   ;;  %v931_v11 = vmov 6  }
   0xe   :  { %103 = vrot.lane.b32.xlu2 %v983_v3, %s922_s30  ;;  %816 = vset.pattern.permute.xlu0 %v923_v6  ;;  %s927_s10 = smov 127   ;;  %s930_s11 = smov 113   ;;  %v933_v12 = vmov 7   ;;  %v934_v13 = vmov 9   ;;  %v1038_v16 = vand.u32 127, %v70_v15  ;;  %v936_v17 = vmov 8  }
   0xf   :  { %s932_s12 = smov 112   ;;  %s935_s13 = smov 111   ;;  %v77_v21 = vld [vmem:[#allocation5] ss:$8 sm:$0xf]  ;;  %vm470_vm11 = vcmask 64512  }
  0x10   :  { %vm111_vm0 = vcmp.lt.s32.totalorder %v1038_v16, 16  ;;  %vm72_vm1 = vcmp.lt.s32.totalorder %v1038_v16, 17  ;;  %v79_v22 = vperm.slane %v77_v21, 0  ;;  %v82_v29 = vperm.slane %v77_v21, 3  ;;  %s767_s23 = sshll.u32 %s1197_s4, 4  ;;  %s768_s23 = int_to_ptr.hbm [resolvable:$true] %s767_s23 }
  0x11   :  { %v80_v30 = vperm.slane %v77_v21, 1  ;;  %v81_v31 = vperm.slane %v77_v21, 2  ;;  %vm151_vm2 = vcmp.lt.s32.totalorder %v1038_v16, 15  ;;  %v117_v56 = vld [vmem:[#allocation5 + $0x1] ss:$8 sm:$0xf] }
  0x12   :  { %v122_v60 = vperm.slane %v117_v56, 3  ;;  %v120_v62 = vperm.slane %v117_v56, 1  ;;  %v119_v63 = vperm.slane %v117_v56, 0  ;;  %v121_v0 = vperm.slane %v117_v56, 2 }
  0x13   :  { %vm191_vm3 = vcmp.lt.s32.totalorder %v1038_v16, 1  ;;  %vm231_vm4 = vcmp.lt.s32.totalorder %v1038_v16, 127  ;;  %vm271_vm5 = vcmp.lt.s32.totalorder %v1038_v16, 113  ;;  %vm311_vm6 = vcmp.lt.s32.totalorder %v1038_v16, 112 }
  0x14   :  { %vm351_vm7 = vcmp.lt.s32.totalorder %v1038_v16, 111 }
  0x15   :  { %66 = vrot.lane.b32.xlu1 %v991_v4, %s921_s29  ;;  %64 = vrot.lane.b32.xlu0 %v996_v5, %s921_s29 }
  0x16   :  { %105 = vrot.lane.b32.xlu2 %v996_v5, %s922_s30 }
  0x1d   :  { %55 = vperm.xlu1 %813, %v1001_v7   ;;  %109 = vrot.lane.b32.xlu0 %v978_v2, %s922_s30 }
  0x1e   :  { %92 = vperm.xlu2 %814, %v1001_v7  }
  0x25   :  { %143 = vrot.lane.b32.xlu1 %v983_v3, %s924_s9  ;;  %107 = vrot.lane.b32.xlu0 %v991_v4, %s922_s30 }
  0x26   :  { %815 = vset.pattern.permute.xlu1 %v925_v8  ;;  %145 = vrot.lane.b32.xlu2 %v996_v5, %s924_s9 }
  0x27   :  { %821 = vset.pattern.permute.xlu2 %v936_v17 }
  0x2d   :  { %132 = vperm.xlu1 %815, %v1001_v7   ;;  %149 = vrot.lane.b32.xlu0 %v978_v2, %s924_s9 }
  0x2e   :  { %147 = vrot.lane.b32.xlu2 %v991_v4, %s924_s9 }
  0x35   :  { %185 = vrot.lane.b32.xlu1 %v996_v5, %s926_s0  ;;  %183 = vrot.lane.b32.xlu0 %v983_v3, %s926_s0 }
  0x36   :  { %189 = vrot.lane.b32.xlu2 %v978_v2, %s926_s0  ;;  %822 = vset.pattern.permute.xlu1 %v934_v13 }
  0x3d   :  { %187 = vrot.lane.b32.xlu1 %v991_v4, %s926_s0  ;;  %172 = vperm.xlu0 %816, %v1001_v7  }
  0x3e   :  { %223 = vrot.lane.b32.xlu2 %v983_v3, %s927_s10 }
  0x45   :  { %225 = vrot.lane.b32.xlu1 %v996_v5, %s927_s10  ;;  %817 = vset.pattern.permute.xlu0 %v928_v9 }
  0x46   :  { %212 = vperm.xlu0 %817, %v1001_v7   ;;  %227 = vrot.lane.b32.xlu2 %v991_v4, %s927_s10 }
  0x4d   :  { %229 = vrot.lane.b32.xlu1 %v978_v2, %s927_s10 }
  0x4e   :  { %818 = vset.pattern.permute.xlu0 %v929_v10  ;;  %263 = vrot.lane.b32.xlu2 %v983_v3, %s930_s11 }
  0x4f   :  { %252 = vperm.xlu0 %818, %v1001_v7  }
  0x55   :  { %265 = vrot.lane.b32.xlu1 %v996_v5, %s930_s11 }
  0x56   :  { %267 = vrot.lane.b32.xlu2 %v991_v4, %s930_s11 }
  0x57   :  { %819 = vset.pattern.permute.xlu0 %v931_v11 }
  0x58   :  { %292 = vperm.xlu0 %819, %v1001_v7  }
  0x5d   :  { %269 = vrot.lane.b32.xlu1 %v978_v2, %s930_s11 }
  0x5e   :  { %303 = vrot.lane.b32.xlu2 %v983_v3, %s932_s12 }
  0x60   :  { %820 = vset.pattern.permute.xlu0 %v933_v12 }
  0x61   :  { %332 = vperm.xlu0 %820, %v1001_v7  }
  0x65   :  { %305 = vrot.lane.b32.xlu1 %v996_v5, %s932_s12 }
  0x66   :  { %307 = vrot.lane.b32.xlu2 %v991_v4, %s932_s12 }
  0x68   :  { %v1036_v14 = vpop.permute.xlu2 %103 }
  0x69   :  { %828 = vset.pattern.permute.xlu0 %v925_v8 }
  0x6d   :  { %309 = vrot.lane.b32.xlu1 %v978_v2, %s932_s12 }
  0x6e   :  { %343 = vrot.lane.b32.xlu2 %v983_v3, %s935_s13 }
  0x70   :  { %v106_v18 = vpop.permute.xlu2 %105 }
  0x71   :  { %v114_v19 = vsel %vm111_vm0, %v1036_v14, %v106_v18 }
  0x72   :  { %v128_v10 = vmul.f32 %v120_v62, %v114_v19 }
  0x75   :  { %345 = vrot.lane.b32.xlu1 %v996_v5, %s935_s13 }
  0x76   :  { %347 = vrot.lane.b32.xlu2 %v991_v4, %s935_s13 }
  0x78   :  { %v93_v20 = vpop.permute.xlu2 %92 }
  0x7d   :  { %349 = vrot.lane.b32.xlu1 %v978_v2, %s935_s13 }
  0x7e   :  { %372 = vperm.xlu2 %821, %v1001_v7  }
  0x7f   :  { %v69_v23 = vpop.permute.xlu1 %68  ;;  %v63_v24 = vpop.permute.xlu0 %62 }
  0x80   :  { %v76_v25 = vsel %vm72_vm1, %v69_v23, %v63_v24  ;;  %v146_v26 = vpop.permute.xlu2 %145 }
  0x81   :  { %v87_v27 = vmul.f32 %v79_v22, %v76_v25 }
  0x83   :  { %v95_v28 = vmul.f32 %v93_v20, %v87_v27 }
  0x85   :  { %384 = vperm.xlu1 %822, %v1001_v7  }
  0x87   :  { %v67_v32 = vpop.permute.xlu1 %66  ;;  %v65_v33 = vpop.permute.xlu0 %64 }
  0x88   :  { %v73_v34 = vsel %vm72_vm1, %v67_v32, %v69_v23  ;;  %v74_v35 = vsel %vm72_vm1, %v65_v33, %v67_v32  ;;  %v75_v36 = vsel %vm72_vm1, %v63_v24, %v65_v33  ;;  %v148_v37 = vpop.permute.xlu2 %147 }
  0x89   :  { %v90_v38 = vmul.f32 %v82_v29, %v73_v34  ;;  %v88_v39 = vmul.f32 %v80_v30, %v75_v36  ;;  %v89_v40 = vmul.f32 %v81_v31, %v74_v35  ;;  %v153_v41 = vsel %vm151_vm2, %v146_v26, %v148_v37 }
  0x8b   :  { %v98_v42 = vmul.f32 %v93_v20, %v90_v38  ;;  %v96_v43 = vmul.f32 %v93_v20, %v88_v39  ;;  %v97_v44 = vmul.f32 %v93_v20, %v89_v40 }
  0x8f   :  { %v56_v45 = vpop.permute.xlu1 %55  ;;  %v110_v46 = vpop.permute.xlu0 %109 }
  0x90   :  { %v58_v47 = vmul.f32 %v56_v45, %v983_v3  ;;  %v59_v48 = vmul.f32 %v56_v45, %v996_v5  ;;  %v60_v49 = vmul.f32 %v56_v45, %v991_v4  ;;  %v61_v50 = vmul.f32 %v56_v45, %v978_v2  ;;  %v1067_v55 = vpop.permute.xlu2 %189 }
  0x91   :  { %v115_v6 = vsel %vm111_vm0, %v110_v46, %v1036_v14  ;;  %v157_v14 = vld [vmem:[#allocation5 + $0x2] ss:$8 sm:$0xf] }
  0x92   :  { %v99_v51 = vadd.f32 %v95_v28, %v58_v47  ;;  %v100_v52 = vadd.f32 %v96_v43, %v59_v48  ;;  %v101_v53 = vadd.f32 %v97_v44, %v60_v49  ;;  %v102_v54 = vadd.f32 %v98_v42, %v61_v50  ;;  %v197_v43 = vld [vmem:[#allocation5 + $0x3] ss:$8 sm:$0xf] }
  0x93   :  { %v127_v11 = vmul.f32 %v119_v63, %v115_v6  ;;  %v160_v19 = vperm.slane %v157_v14, 1  ;;  %v159_v30 = vperm.slane %v157_v14, 0  ;;  %v161_v31 = vperm.slane %v157_v14, 2 }
  0x94   :  { %v162_v32 = vperm.slane %v157_v14, 3  ;;  %v200_v50 = vperm.slane %v197_v43, 1 }
  0x95   :  { %v169_v38 = vmul.f32 %v161_v31, %v153_v41  ;;  %v201_v41 = vperm.slane %v197_v43, 2 }
  0x97   :  { %v144_v57 = vpop.permute.xlu1 %143  ;;  %v108_v58 = vpop.permute.xlu0 %107 }
  0x98   :  { %v154_v59 = vsel %vm151_vm2, %v144_v57, %v146_v26  ;;  %v112_v61 = vsel %vm111_vm0, %v108_v58, %v110_v46  ;;  %v113_v8 = vsel %vm111_vm0, %v106_v18, %v108_v58  ;;  %v1078_v13 = vpop.permute.xlu2 %223 }
  0x99   :  { %v130_v9 = vmul.f32 %v122_v60, %v112_v61  ;;  %v129_v12 = vmul.f32 %v121_v0, %v113_v8  ;;  %v168_v35 = vmul.f32 %v160_v19, %v154_v59  ;;  %v277_v19 = vld [vmem:[#allocation5 + $0x5] ss:$8 sm:$0xf] }
  0x9f   :  { %v133_v15 = vpop.permute.xlu1 %132  ;;  %v150_v17 = vpop.permute.xlu0 %149 }
  0xa0   :  { %v135_v20 = vmul.f32 %v133_v15, %v127_v11  ;;  %v136_v21 = vmul.f32 %v133_v15, %v128_v10  ;;  %v137_v22 = vmul.f32 %v133_v15, %v129_v12  ;;  %v138_v23 = vmul.f32 %v133_v15, %v130_v9  ;;  %v1080_v18 = vpop.permute.xlu2 %227 }
  0xa1   :  { %v155_v33 = vsel %vm151_vm2, %v150_v17, %v144_v57  ;;  %v152_v34 = vsel %vm151_vm2, %v148_v37, %v150_v17 }
  0xa2   :  { %v139_v24 = vadd.f32 %v135_v20, %v99_v51  ;;  %v140_v25 = vadd.f32 %v136_v21, %v100_v52  ;;  %v141_v26 = vadd.f32 %v137_v22, %v101_v53  ;;  %v142_v27 = vadd.f32 %v138_v23, %v102_v54 }
  0xa3   :  { %v167_v36 = vmul.f32 %v159_v30, %v155_v33  ;;  %v170_v39 = vmul.f32 %v162_v32, %v152_v34  ;;  %v202_v54 = vperm.slane %v197_v43, 3 }
  0xa7   :  { %v186_v28 = vpop.permute.xlu1 %185  ;;  %v184_v29 = vpop.permute.xlu0 %183 }
  0xa8   :  { %v1087_v53 = vpop.permute.xlu2 %263  ;;  %v194_v37 = vsel %vm191_vm3, %v184_v29, %v186_v28 }
  0xa9   :  { %v208_v58 = vmul.f32 %v200_v50, %v194_v37 }
  0xaf   :  { %v188_v40 = vpop.permute.xlu1 %187  ;;  %v173_v42 = vpop.permute.xlu0 %172 }
  0xb0   :  { %v175_v44 = vmul.f32 %v173_v42, %v167_v36  ;;  %v176_v45 = vmul.f32 %v173_v42, %v168_v35  ;;  %v177_v46 = vmul.f32 %v173_v42, %v169_v38  ;;  %v178_v47 = vmul.f32 %v173_v42, %v170_v39  ;;  %v268_v11 = vpop.permute.xlu2 %267  ;;  %v317_v39 = vld [vmem:[#allocation5 + $0x6] ss:$8 sm:$0xf] }
  0xb1   :  { %v192_v56 = vsel %vm191_vm3, %v188_v40, %v1067_v55  ;;  %v193_v57 = vsel %vm191_vm3, %v186_v28, %v188_v40  ;;  %v280_v42 = vperm.slane %v277_v19, 1 }
  0xb2   :  { %v179_v48 = vadd.f32 %v175_v44, %v139_v24  ;;  %v180_v49 = vadd.f32 %v176_v45, %v140_v25  ;;  %v181_v51 = vadd.f32 %v177_v46, %v141_v26  ;;  %v182_v52 = vadd.f32 %v178_v47, %v142_v27  ;;  %v237_v27 = vld [vmem:[#allocation5 + $0x4] ss:$8 sm:$0xf] }
  0xb3   :  { %v209_v60 = vmul.f32 %v201_v41, %v193_v57  ;;  %v210_v61 = vmul.f32 %v202_v54, %v192_v56  ;;  %v199_v24 = vperm.slane %v197_v43, 0  ;;  %v195_v26 = vsel %vm191_vm3, %v1067_v55, %v184_v29 }
  0xb4   :  { %v241_v28 = vperm.slane %v237_v27, 2  ;;  %v239_v31 = vperm.slane %v237_v27, 0  ;;  %v242_v32 = vperm.slane %v237_v27, 3  ;;  %v240_v34 = vperm.slane %v237_v27, 1 }
  0xb5   :  { %v207_v14 = vmul.f32 %v199_v24, %v195_v26  ;;  %v279_v29 = vperm.slane %v277_v19, 0  ;;  %v281_v43 = vperm.slane %v277_v19, 2  ;;  %v282_v44 = vperm.slane %v277_v19, 3 }
  0xb6   :  { %v322_v56 = vperm.slane %v317_v39, 3 }
  0xb7   :  { %v226_v59 = vpop.permute.xlu1 %225 }
  0xb8   :  { %v213_v62 = vpop.permute.xlu0 %212  ;;  %v304_v17 = vpop.permute.xlu2 %303  ;;  %v234_v35 = vsel %vm231_vm4, %v1078_v13, %v226_v59  ;;  %v233_v55 = vsel %vm231_vm4, %v226_v59, %v1080_v18 }
  0xb9   :  { %v216_v63 = vmul.f32 %v213_v62, %v208_v58  ;;  %v217_v0 = vmul.f32 %v213_v62, %v209_v60  ;;  %v218_v6 = vmul.f32 %v213_v62, %v210_v61  ;;  %v215_v36 = vmul.f32 %v213_v62, %v207_v14  ;;  %v357_v60 = vld [vmem:[#allocation5 + $0x7] ss:$8 sm:$0xf] }
  0xba   :  { %v247_v45 = vmul.f32 %v239_v31, %v234_v35  ;;  %v248_v50 = vmul.f32 %v240_v34, %v233_v55  ;;  %v359_v24 = vperm.slane %v357_v60, 0  ;;  %v362_v34 = vperm.slane %v357_v60, 3 }
  0xbb   :  { %v1096_v8 = vadd.f32 %v216_v63, %v180_v49  ;;  %v1098_v9 = vadd.f32 %v217_v0, %v181_v51  ;;  %v1100_v10 = vadd.f32 %v218_v6, %v182_v52  ;;  %v319_v49 = vperm.slane %v317_v39, 0 }
  0xbc   :  { %v219_v51 = vadd.f32 %v215_v36, %v179_v48  ;;  %v320_v52 = vperm.slane %v317_v39, 1 }
  0xbf   :  { %v230_v12 = vpop.permute.xlu1 %229 }
  0xc0   :  { %v308_v21 = vpop.permute.xlu2 %307  ;;  %v232_v33 = vsel %vm231_vm4, %v1080_v18, %v230_v12  ;;  %v235_v38 = vsel %vm231_vm4, %v230_v12, %v1078_v13  ;;  %v321_v13 = vperm.slane %v317_v39, 2 }
  0xc1   :  { %v253_v23 = vpop.permute.xlu0 %252  ;;  %v249_v40 = vmul.f32 %v241_v28, %v232_v33  ;;  %v250_v46 = vmul.f32 %v242_v32, %v235_v38  ;;  %v361_v33 = vperm.slane %v357_v60, 2 }
  0xc2   :  { %v255_v41 = vmul.f32 %v253_v23, %v247_v45  ;;  %v256_v57 = vmul.f32 %v253_v23, %v248_v50 }
  0xc3   :  { %v257_v58 = vmul.f32 %v253_v23, %v249_v40  ;;  %v258_v62 = vmul.f32 %v253_v23, %v250_v46  ;;  %v360_v23 = vperm.slane %v357_v60, 1 }
  0xc4   :  { %v259_v19 = vadd.f32 %v255_v41, %v219_v51  ;;  %v260_v31 = vadd.f32 %v256_v57, %v1096_v8 }
  0xc5   :  { %v261_v55 = vadd.f32 %v257_v58, %v1098_v9 }
  0xc7   :  { %v266_v15 = vpop.permute.xlu1 %265 }
  0xc8   :  { %v1102_v25 = vpop.permute.xlu2 %343  ;;  %v274_v18 = vsel %vm271_vm5, %v1087_v53, %v266_v15  ;;  %v273_v59 = vsel %vm271_vm5, %v266_v15, %v268_v11 }
  0xc9   :  { %v287_v6 = vmul.f32 %v279_v29, %v274_v18  ;;  %v262_v29 = vadd.f32 %v258_v62, %v1100_v10 }
  0xca   :  { %v293_v47 = vpop.permute.xlu0 %292 }
  0xcf   :  { %v270_v20 = vpop.permute.xlu1 %269 }
  0xd0   :  { %v348_v37 = vpop.permute.xlu2 %347  ;;  %v272_v54 = vsel %vm271_vm5, %v268_v11, %v270_v20  ;;  %v275_v48 = vsel %vm271_vm5, %v270_v20, %v1087_v53  ;;  %v288_v53 = vmul.f32 %v280_v42, %v273_v59 }
  0xd1   :  { %v289_v12 = vmul.f32 %v281_v43, %v272_v54  ;;  %v290_v20 = vmul.f32 %v282_v44, %v275_v48 }
  0xd2   :  { %v296_v35 = vmul.f32 %v293_v47, %v288_v53 }
  0xd3   :  { %v298_v36 = vmul.f32 %v293_v47, %v290_v20 }
  0xd4   :  { %v300_v9 = vadd.f32 %v296_v35, %v260_v31 }
  0xd7   :  { %v306_v22 = vpop.permute.xlu1 %305 }
  0xd8   :  { %v314_v63 = vsel %vm311_vm6, %v304_v17, %v306_v22  ;;  %v313_v11 = vsel %vm311_vm6, %v306_v22, %v308_v21  ;;  %v333_v22 = vpop.permute.xlu0 %332  ;;  %v373_v43 = vpop.permute.xlu2 %372 }
  0xd9   :  { %v327_v26 = vmul.f32 %v319_v49, %v314_v63 }
  0xdb   :  { %v335_v40 = vmul.f32 %v333_v22, %v327_v26 }
  0xdf   :  { %v310_v30 = vpop.permute.xlu1 %309 }
  0xe0   :  { %v312_v0 = vsel %vm311_vm6, %v308_v21, %v310_v30  ;;  %v315_v15 = vsel %vm311_vm6, %v310_v30, %v304_v17  ;;  %v328_v21 = vmul.f32 %v320_v52, %v313_v11  ;;  %v295_v17 = vmul.f32 %v293_v47, %v287_v6 }
  0xe1   :  { %v329_v27 = vmul.f32 %v321_v13, %v312_v0  ;;  %v330_v32 = vmul.f32 %v322_v56, %v315_v15  ;;  %v297_v30 = vmul.f32 %v293_v47, %v289_v12  ;;  %v302_v13 = vadd.f32 %v298_v36, %v262_v29 }
  0xe2   :  { %v336_v8 = vmul.f32 %v333_v22, %v328_v21  ;;  %v299_v47 = vadd.f32 %v295_v17, %v259_v19 }
  0xe3   :  { %v337_v42 = vmul.f32 %v333_v22, %v329_v27  ;;  %v338_v45 = vmul.f32 %v333_v22, %v330_v32  ;;  %v301_v50 = vadd.f32 %v297_v30, %v261_v55 }
  0xe4   :  { %v339_v57 = vadd.f32 %v335_v40, %v299_v47  ;;  %v340_v58 = vadd.f32 %v336_v8, %v300_v9  ;;  %v938_v40 = vmov 12  }
  0xe5   :  { %v341_v18 = vadd.f32 %v337_v42, %v301_v50  ;;  %v342_v59 = vadd.f32 %v338_v45, %v302_v13 }
  0xe7   :  { %v346_v61 = vpop.permute.xlu1 %345 }
  0xe8   :  { %v353_v14 = vsel %vm351_vm7, %v346_v61, %v348_v37  ;;  %v354_v28 = vsel %vm351_vm7, %v1102_v25, %v346_v61 }
  0xe9   :  { %v367_v38 = vmul.f32 %v359_v24, %v354_v28  ;;  %v368_v39 = vmul.f32 %v360_v23, %v353_v14  ;;  %v937_v28 = vmov 11  }
  0xea   :  { %823 = vset.pattern.permute.xlu1 %v937_v28 }
  0xeb   :  { %v375_v10 = vmul.f32 %v373_v43, %v367_v38  ;;  %v376_v41 = vmul.f32 %v373_v43, %v368_v39 }
  0xed   :  { %v379_v60 = vadd.f32 %v375_v10, %v339_v57  ;;  %v380_v61 = vadd.f32 %v376_v41, %v340_v58 }
  0xef   :  { %v350_v44 = vpop.permute.xlu1 %349 }
  0xf0   :  { %v352_v46 = vsel %vm351_vm7, %v348_v37, %v350_v44  ;;  %v355_v49 = vsel %vm351_vm7, %v350_v44, %v1102_v25  ;;  %v939_v44 = vmov 10  }
  0xf1   :  { %v369_v51 = vmul.f32 %v361_v33, %v352_v46  ;;  %v370_v52 = vmul.f32 %v362_v34, %v355_v49 }
  0xf3   :  { %v377_v54 = vmul.f32 %v373_v43, %v369_v51  ;;  %v378_v56 = vmul.f32 %v373_v43, %v370_v52 }
  0xf5   :  { %v381_v48 = vadd.f32 %v377_v54, %v341_v18  ;;  %v382_v37 = vadd.f32 %v378_v56, %v342_v59 }
  0xf7   :  { %v385_v16 = vpop.permute.xlu1 %384 }
  0xf8   :  { %v387_v25 = vadd.f32 %v385_v16, %v379_v60  ;;  %v388_v62 = vadd.f32 %v385_v16, %v380_v61  ;;  %v389_v63 = vadd.f32 %v385_v16, %v381_v48  ;;  %v390_v0 = vadd.f32 %v385_v16, %v382_v37 }
  0xfa   :  { %v391_v6 = vadd.f32 %v388_v62, %v387_v25  ;;  %v396_v12 = vmul.f32 %v387_v25, %v387_v25  ;;  %v397_v11 = vmul.f32 %v388_v62, %v388_v62  ;;  %v398_v53 = vmul.f32 %v389_v63, %v389_v63 }
  0xfb   :  { %v399_v23 = vmul.f32 %v390_v0, %v390_v0 }
  0xfc   :  { %v392_v15 = vadd.f32 %v391_v6, %v389_v63  ;;  %v400_v20 = vadd.f32 %v397_v11, %v396_v12 }
  0xfe   :  { %v393_v24 = vadd.f32 %v392_v15, %v390_v0  ;;  %v401_v26 = vadd.f32 %v400_v20, %v398_v53  ;;  %v465_v15 = vld [vmem:[%s1195_s2] sm:$0xff]  ;;  %v554_v53 = vld [vmem:[#allocation5 + $0x20] sm:$0x3]  ;;  %v555_v20 = vld [vmem:[#allocation5 + $0x28] sm:$0x3] }
 0x100   :  { %394 = vadd.xlane.f32.xlu2 %v393_v24  ;;  %v402_v27 = vadd.f32 %v401_v26, %v399_v23  ;;  %v556_v24 = vld [vmem:[#allocation5 + $0x30] sm:$0x3]  ;;  %v557_v23 = vld [vmem:[#allocation5 + $0x38] sm:$0x3] }
 0x102   :  { %403 = vadd.xlane.f32.xlu0 %v402_v27 }
 0x173   :  { %v395_v14 = vpop.xlane.xlu2 %394 }
 0x174   :  { %v405_v19 = vmul.f32 0.001953125, %v395_v14 }
 0x175   :  { %v404_v31 = vpop.xlane.xlu0 %403 }
 0x176   :  { %v407_v21 = vmul.f32 %v405_v19, %v405_v19  ;;  %v406_v22 = vmul.f32 0.001953125, %v404_v31 }
 0x178   :  { %v408_v32 = vsub.f32 %v406_v22, %v407_v21 }
 0x17a   :  { %v409_v17 = vadd.f32 1e-05, %v408_v32 }
 0x17c   :  { %831 = vrsqrt.f32 %v409_v17  ;;  %vm416_vm9 = vweird.f32 %v409_v17 }
 0x182   :  { %v832_v30 = vpop.eup %831 }
 0x183   :  { %v411_v33 = vmul.f32 %v832_v30, %v409_v17  ;;  %vm417_vm8 = vweird.f32 %v832_v30  ;;  %v940_v17 = vmov 13  }
 0x184   :  { %vm418_vm10 = vmor %vm416_vm9, %vm417_vm8 }
 0x185   :  { %v412_v34 = vmul.f32 %v832_v30, %v411_v33 }
 0x187   :  { %v413_v35 = vmul.f32 0.5, %v412_v34 }
 0x189   :  { %v414_v36 = vsub.f32 1.5, %v413_v35 }
 0x18b   :  { %v415_v38 = vmul.f32 %v832_v30, %v414_v36 }
 0x18d   :  { %v419_v39 = vsel %vm418_vm10, %v832_v30, %v415_v38 }
 0x18e   :  { %v420_v55 = vmul.f32 %v419_v39, %v1001_v7 }
 0x190   :  { %v421_v29 = vmul.f32 %v420_v55, %v405_v19 }
 0x192   :  { %423 = vrot.lane.b32.xlu1 %v421_v29, %s926_s0  ;;  %v639_v29 = vld [vmem:[%s1195_s2 + $0x8] sm:$0xff] }
 0x19a   :  { %429 = vperm.xlu1 %823, %v420_v55  }
 0x1a2   :  { %824 = vset.pattern.permute.xlu1 %v938_v40  ;;  %v941_v40 = vmov 14  }
 0x1a3   :  { %827 = vset.pattern.permute.xlu2 %v941_v40 }
 0x1a4   :  { %670 = vperm.xlu2 %827, %v1001_v7  }
 0x204   :  { %v424_v42 = vpop.permute.xlu1 %423 }
 0x205   :  { %v426_v43 = vsub.f32 %v1001_v7, %v424_v42 }
 0x207   :  { %438 = vperm.xlu1 %824, %v426_v43  }
 0x20c   :  { %v430_v8 = vpop.permute.xlu1 %429 }
 0x20d   :  { %v432_v45 = vmul.f32 %v430_v8, %v387_v25  ;;  %v433_v46 = vmul.f32 %v430_v8, %v388_v62  ;;  %v434_v49 = vmul.f32 %v430_v8, %v389_v63  ;;  %v435_v47 = vmul.f32 %v430_v8, %v390_v0 }
 0x20f   :  { %825 = vset.pattern.permute.xlu1 %v939_v44 }
 0x210   :  { %467 = vperm.xlu1 %825, %v1001_v7  }
 0x218   :  { %826 = vset.pattern.permute.xlu1 %v940_v17 }
 0x219   :  { %642 = vperm.xlu1 %826, %v1001_v7  }
 0x221   :  { %829 = vset.pattern.permute.xlu1 %v920_v1 }
 0x279   :  { %v439_v50 = vpop.permute.xlu1 %438 }
 0x27a   :  { %v441_v51 = vadd.f32 %v439_v50, %v432_v45  ;;  %v442_v52 = vadd.f32 %v439_v50, %v433_v46  ;;  %v443_v9 = vadd.f32 %v439_v50, %v434_v49  ;;  %v444_v13 = vadd.f32 %v439_v50, %v435_v47  ;;  %v640_v45 = vld [vmem:[%s1195_s2 + $0x10] sm:$0xff]  ;;  %v671_v46 = vpop.permute.xlu2 %670  ;;  %s942_s2 = smov [#allocation7]  }
 0x27b   :  { %s765_s20 = sshll.u32 %s942_s2, 4  ;;  %s766_s20 = int_to_ptr.vmem [resolvable:$true] %s765_s20 }
 0x27c   :  { %v445_v10 = vadd.f32 3.0, %v441_v51  ;;  %v446_v41 = vadd.f32 3.0, %v442_v52  ;;  %v447_v18 = vadd.f32 3.0, %v443_v9  ;;  %v448_v54 = vadd.f32 3.0, %v444_v13 }
 0x27e   :  { %v449_v56 = vmax.f32 %v445_v10, 0.0  ;;  %v450_v57 = vmax.f32 %v446_v41, 0.0  ;;  %v451_v58 = vmax.f32 %v447_v18, 0.0  ;;  %v452_v59 = vmax.f32 %v448_v54, 0.0 }
 0x280   :  { %v453_v48 = vmin.f32 %v449_v56, 6.0  ;;  %v454_v37 = vmin.f32 %v450_v57, 6.0  ;;  %v455_v60 = vmin.f32 %v451_v58, 6.0  ;;  %v456_v61 = vmin.f32 %v452_v59, 6.0 }
 0x282   :  { %v457_v16 = vmul.f32 %v453_v48, %v441_v51  ;;  %v458_v25 = vmul.f32 %v454_v37, %v442_v52  ;;  %v459_v62 = vmul.f32 %v455_v60, %v443_v9  ;;  %v460_v63 = vmul.f32 %v456_v61, %v444_v13  ;;  %v468_v26 = vpop.permute.xlu1 %467  ;;  %v721_v37 = vld [vmem:[#allocation5 + $0x21] ss:$8 sm:$0xf] }
 0x283   :  { %v728_v60 = vperm.slane %v721_v37, 0  ;;  %v729_v61 = vperm.slane %v721_v37, 1 }
 0x284   :  { %v461_v0 = vmul.f32 0.16666667, %v457_v16  ;;  %v462_v6 = vmul.f32 0.16666667, %v458_v25  ;;  %v463_v12 = vmul.f32 0.16666667, %v459_v62 }
 0x285   :  { %v464_v11 = vmul.f32 0.16666667, %v460_v63  ;;  %v730_v16 = vperm.slane %v721_v37, 2  ;;  %v731_v25 = vperm.slane %v721_v37, 3 }
 0x286   :  { %489 = vmatpush.msra.mxu0 %v461_v0  ;;  %509 = vmatpush.msra.mxu1 %v462_v6 }
 0x287   :  { %529 = vmatpush.msra.mxu2 %v463_v12  ;;  %549 = vmatpush.msra.mxu3 %v464_v11 }
 0x288   :  { %780 = vmatmul.msk.f32.vlgmr.msra.gmra.mxu2 %vm470_vm11, %v465_v15  ;;  %781 = vmatmul.msk.f32.vlgmr.msra.gmra.mxu3 %vm470_vm11, %v465_v15 }
 0x289   :  { %778 = vmatmul.msk.f32.vlgmr.msra.gmra.mxu0 %vm470_vm11, %v465_v15  ;;  %779 = vmatmul.msk.f32.vlgmr.msra.gmra.mxu1 %vm470_vm11, %v465_v15 }
 0x28a   :  { %573 = vmatpush.xpose.msrb.mxu0 %v554_v53  ;;  %593 = vmatpush.xpose.msrb.mxu1 %v555_v20 }
 0x28b   :  { %613 = vmatpush.xpose.msrb.mxu2 %v556_v24  ;;  %633 = vmatpush.xpose.msrb.mxu3 %v557_v23  ;;  %v643_v42 = vpop.permute.xlu1 %642 }
 0x306   :  { %v491_v27 = vpop.f32.mrf.mxu0  ;;  %v511_v14 = vpop.f32.mrf.mxu1 }
 0x307   :  { %v1157_v28 = vadd.f32 %v491_v27, %v468_v26  ;;  %v1159_v19 = vadd.f32 %v511_v14, %v468_v26 }
 0x309   :  { %574 = vmatmul.f32.vlgmr.msrb.gmra.mxu0 %v1157_v28  ;;  %594 = vmatmul.f32.vlgmr.msrb.gmra.mxu1 %v1159_v19 }
 0x30b   :  { %v531_v31 = vpop.f32.mrf.mxu2  ;;  %v551_v21 = vpop.f32.mrf.mxu3 }
 0x30c   :  { %v1163_v22 = vadd.f32 %v531_v31, %v468_v26  ;;  %v1165_v32 = vadd.f32 %v551_v21, %v468_v26 }
 0x30e   :  { %614 = vmatmul.f32.vlgmr.msrb.gmra.mxu2 %v1163_v22  ;;  %634 = vmatmul.f32.vlgmr.msrb.gmra.mxu3 %v1165_v32 }
 0x386   :  { %v575_v30 = vpop.f32.mrf.mxu0  ;;  %v595_v33 = vpop.f32.mrf.mxu1 }
 0x387   :  { %v596_v34 = vadd.f32 %v595_v33, %v575_v30 }
 0x391   :  { %v615_v35 = vpop.f32.mrf.mxu2  ;;  %v635_v38 = vpop.f32.mrf.mxu3 }
 0x392   :  { %v616_v36 = vadd.f32 %v615_v35, %v596_v34 }
 0x394   :  { %v636_v39 = vadd.f32 %v635_v38, %v616_v36 }
 0x396   :  { %v638_v55 = vmul.f32 0.00390625, %v636_v39 }
 0x398   :  { %663 = vmatpush.msra.mxu0 %v638_v55 }
 0x399   :  { %782 = vmatmul.msk.f32.vlgmr.msra.gmra.mxu0 %vm470_vm11, %v639_v29 }
 0x416   :  { %v665_v43 = vpop.f32.mrf.mxu0 }
 0x417   :  { %v666_v44 = vadd.f32 %v665_v43, %v643_v42 }
 0x419   :  { %v668_v8 = vmax.f32 %v666_v44, 0.0 }
 0x41b   :  { %691 = vmatpush.msra.mxu1 %v668_v8 }
 0x41c   :  { %783 = vmatmul.msk.f32.vlgmr.msra.gmra.mxu1 %vm470_vm11, %v640_v45 }
 0x499   :  { %v693_v49 = vpop.f32.mrf.mxu1 }
 0x49a   :  { %v694_v47 = vadd.f32 %v693_v49, %v671_v46 }
 0x49c   :  { %v784_v50 = vmul.f32 -1.442695, %v694_v47 }
 0x49e   :  { %833 = vpow2.f32 %v784_v50 }
 0x4a4   :  { %v834_v51 = vpop.eup %833 }
 0x4a5   :  { %v699_v52 = vadd.f32 1.0, %v834_v51 }
 0x4a7   :  { %835 = vrcp.f32 %v699_v52  ;;  %v711_v10 = vand.u32 2147483648, %v699_v52  ;;  %v709_v18 = vand.u32 2147483647, %v699_v52  ;;  %vm705_vm13 = vweird.f32 %v699_v52 }
 0x4a9   :  { %v712_v56 = vor.u32 1.1754944e-38, %v711_v10  ;;  %vm710_vm15 = vcmp.eq.f32.partialorder %v709_v18, 8.507059e+37 }
 0x4ad   :  { %v836_v7 = vpop.eup %835 }
 0x4ae   :  { %v701_v9 = vmul.f32 %v836_v7, %v699_v52  ;;  %vm706_vm12 = vweird.f32 %v836_v7 }
 0x4af   :  { %vm707_vm14 = vmor %vm705_vm13, %vm706_vm12 }
 0x4b0   :  { %v702_v13 = vsub.f32 1.0, %v701_v9 }
 0x4b2   :  { %v703_v41 = vmul.f32 %v836_v7, %v702_v13 }
 0x4b4   :  { %v704_v54 = vadd.f32 %v836_v7, %v703_v41 }
 0x4b6   :  { %v708_v57 = vsel %vm707_vm14, %v836_v7, %v704_v54 }
 0x4b7   :  { %v713_v58 = vsel %vm710_vm15, %v712_v56, %v708_v57 }
 0x4b8   :  { %716 = vrot.lane.b32.xlu1 %v713_v58, %s926_s0 }
 0x4c0   :  { %741 = vperm.xlu1 %829, %v713_v58  }
 0x52a   :  { %v717_v59 = vpop.permute.xlu1 %716 }
 0x52b   :  { %v719_v48 = vsub.f32 %v713_v58, %v717_v59 }
 0x52d   :  { %724 = vperm.xlu0 %828, %v719_v48  }
 0x532   :  { %v742_v11 = vpop.permute.xlu1 %741 }
 0x535   :  { %830 = vset.pattern.permute.xlu0 %v920_v1 }
 0x59f   :  { %v725_v62 = vpop.permute.xlu0 %724 }
 0x5a0   :  { %v736_v63 = vmul.f32 %v728_v60, %v725_v62  ;;  %v737_v0 = vmul.f32 %v729_v61, %v725_v62  ;;  %v738_v6 = vmul.f32 %v730_v16, %v725_v62  ;;  %v739_v12 = vmul.f32 %v731_v25, %v725_v62 }
 0x5a2   :  { %v744_v15 = vadd.f32 %v742_v11, %v736_v63  ;;  %v745_v53 = vadd.f32 %v742_v11, %v737_v0  ;;  %v746_v20 = vadd.f32 %v742_v11, %v738_v6  ;;  %v747_v24 = vadd.f32 %v742_v11, %v739_v12 }
 0x5a4   :  { %v748_v23 = vmul.f32 %v744_v15, %v1157_v28  ;;  %v749_v26 = vmul.f32 %v745_v53, %v1159_v19  ;;  %v750_v1 = vmul.f32 %v746_v20, %v1163_v22  ;;  %v751_v27 = vmul.f32 %v747_v24, %v1165_v32 }
 0x5a6   :  { %v752_v14 = vadd.f32 %v748_v23, %v983_v3  ;;  %v753_v31 = vadd.f32 %v749_v26, %v996_v5  ;;  %v754_v21 = vadd.f32 %v750_v1, %v991_v4  ;;  %v755_v28 = vadd.f32 %v751_v27, %v978_v2 }
 0x5a8   :  { %756 = vst [vmem:[#allocation7] sm:$0xff] %v752_v14 }
 0x5a9   :  { %757 = vst [vmem:[#allocation7 + $0x8] sm:$0xff] %v753_v31 }
 0x5aa   :  { %758 = vst [vmem:[#allocation7 + $0x10] sm:$0xff] %v754_v21 }
 0x5ab   :  { %759 = vst [vmem:[#allocation7 + $0x18] sm:$0xff] %v755_v28 }
 0x5ac   :  { %770 = dma.vmem_to_hbm [thread:$0]  %s766_s20, 512, %s768_s23, [#allocation4]  }
 0x5ad   :  { %913 = dma.done.wait [#allocation4], 512  }
 0x5ae   :  { %914 = vsyncadd [#allocation4], 4294966784 }
 0x5af   :  { %775 = vsyncpa [#allocation3], 1 }
 0x5b0   :  { %776 = vsyncpa [#allocation6], 1 }
 0x5b1   :  { %777 = vsyncpa [#allocation4], 1 }

</bundles_post_ra>
